<compile_context>
chip_gen: v7x
topology: tpu7x:2x2x1
jax: 0.10.0
libtpu: 0.0.40
codegen_flags: <defaults>
</compile_context>

<pallas_src>
import functools

import jax
import jax.numpy as jnp
from jax.experimental import pallas as pl
from jax.experimental.pallas import tpu as pltpu


def _cdiv(a, b):
    return (a + b - 1) // b


def _round_up(a, b):
    return _cdiv(a, b) * b


def _focal_loss_kernel(logits_ref, labels_ref, out_ref, acc_ref, *,
                       gamma, alpha, n, block_rows, blocks_per_part):
    p = pl.program_id(0)   # partition ("parallel"; maps to a TC on v7x)
    j = pl.program_id(1)   # batch block within partition ("arbitrary" reduction)

    @pl.when(j == 0)
    def _init():
        acc_ref[...] = jnp.zeros_like(acc_ref)

    x = logits_ref[...].astype(jnp.float32)          # (BN, C)
    lbl = labels_ref[...]                            # (BN, 1) int32

    # Numerically-stable log-softmax pieces.
    m = jnp.max(x, axis=-1, keepdims=True)           # (BN, 1)
    z = x - m                                        # (BN, C)
    lse = jnp.log(jnp.sum(jnp.exp(z), axis=-1, keepdims=True))  # (BN, 1)

    # Gather z[i, labels[i]] via one-hot compare (no dynamic gather on TPU).
    # NOTE: labels outside [0, C) silently contribute z_y = 0 (undefined in
    # torch.cross_entropy as well).
    col = jax.lax.broadcasted_iota(jnp.int32, x.shape, 1)        # (BN, C)
    z_y = jnp.sum(jnp.where(col == lbl, z, 0.0),
                  axis=-1, keepdims=True)                        # (BN, 1)

    ce = jnp.maximum(lse - z_y, 0.0)                 # clamp fp noise, keep pt <= 1
    pt = jnp.exp(-ce)
    w = 1.0 - pt

    g = float(gamma)
    if g == int(g) and 0 <= int(g) <= 16:
        gi = int(g)
        if gi == 0:
            w_pow = jnp.ones_like(w)
        else:
            w_pow = w
            for _ in range(gi - 1):                  # integer gamma: VPU multiplies only
                w_pow = w_pow * w
    else:
        w_pow = jnp.power(jnp.maximum(w, 0.0), jnp.float32(g))

    focal = w_pow * ce                               # (BN, 1)
    if float(alpha) != 1.0:
        focal = jnp.float32(alpha) * focal

    # Mask padded tail rows so they don't pollute the mean.
    row = jax.lax.broadcasted_iota(jnp.int32, focal.shape, 0)    # (BN, 1)
    global_row = (p * blocks_per_part + j) * block_rows + row
    focal = jnp.where(global_row < n, focal, 0.0)

    acc_ref[...] += jnp.sum(focal).reshape(1, 1)

    @pl.when(j == pl.num_programs(1) - 1)
    def _finalize():
        part = acc_ref[...] * jnp.float32(1.0 / n)               # (1, 1) partial mean
        out_ref[...] = jnp.broadcast_to(part, out_ref.shape)     # lane-dense store


def focal_loss(logits, labels, gamma=2, alpha=1, *,
               block_rows=None, num_partitions=2,
               block_bytes_target=4 * 1024 * 1024):
    """logits: (N, C) float (f32 or bf16); labels: (N,) int. Returns scalar f32."""
    n, c = logits.shape
    labels2d = labels.astype(jnp.int32).reshape(n, 1)

    # Row-tile size: ~4 MiB of logits per block (double-buffered -> ~8 MiB,
    # safe for v7x's 64 MiB VMEM as well as v5e/v6e), multiple of 8 sublanes.
    itemsize = jnp.dtype(logits.dtype).itemsize
    if block_rows is None:
        rows = block_bytes_target // max(1, c * itemsize)
        rows = max(8, min(1024, rows))
    else:
        rows = int(block_rows)
    rows = max(8, (rows // 8) * 8)
    rows = min(rows, _round_up(n, 8))
    bn = rows

    p = max(1, int(num_partitions))                  # 2 -> both TCs on v7x
    bpp = _cdiv(_cdiv(n, bn), p)                     # blocks per partition
    n_pad = p * bpp * bn
    if n_pad != n:
        logits = jnp.pad(logits, ((0, n_pad - n), (0, 0)))
        labels2d = jnp.pad(labels2d, ((0, n_pad - n), (0, 0)))

    kernel = functools.partial(
        _focal_loss_kernel, gamma=float(gamma), alpha=float(alpha),
        n=n, block_rows=bn, blocks_per_part=bpp)

    def in_index(pi, ji):
        return (pi * bpp + ji, 0)

    out = pl.pallas_call(
        kernel,
        out_shape=jax.ShapeDtypeStruct((p * 8, 128), jnp.float32),
        grid_spec=pltpu.PrefetchScalarGridSpec(
            num_scalar_prefetch=0,
            grid=(p, bpp),
            in_specs=[
                pl.BlockSpec((bn, c), in_index),     # logits row tile
                pl.BlockSpec((bn, 1), in_index),     # matching label tile
            ],
            out_specs=pl.BlockSpec((8, 128), lambda pi, ji: (pi, 0)),
            scratch_shapes=[pltpu.VMEM((1, 1), jnp.float32)],
        ),
        compiler_params=pltpu.CompilerParams(
            dimension_semantics=("parallel", "arbitrary")),
    )(logits, labels2d)

    partials = out.reshape(p, 8, 128)[:, 0, 0]       # one partial mean per partition
    return jnp.sum(partials)


def _reference_focal_loss(logits, labels, gamma=2, alpha=1):
    # Pure-JAX reference for sanity checking.
    logits = logits.astype(jnp.float32)
    logp = jax.nn.log_softmax(logits, axis=-1)
    ce = -jnp.take_along_axis(logp, labels[:, None].astype(jnp.int32), axis=-1)[:, 0]
    pt = jnp.exp(-ce)
    return jnp.mean(alpha * (1.0 - pt) ** gamma * ce)


if __name__ == "__main__":
    key = jax.random.PRNGKey(0)
    k1, k2 = jax.random.split(key)

    N, C = 24, 32                    # small demo: batch=24, num_classes=32
    logits = jax.random.normal(k1, (N, C), dtype=jnp.float32)
    labels = jax.random.randint(k2, (N,), 0, C, dtype=jnp.int32)

    # Small block_rows to exercise the multi-block accumulator, the 2-way
    # partition split, and the padded-tail masking on the tiny demo shape.
    loss = focal_loss(logits, labels, gamma=2, alpha=1, block_rows=8)
    loss = jax.block_until_ready(loss)

    ref = jax.block_until_ready(_reference_focal_loss(logits, labels, gamma=2, alpha=1))
    assert jnp.allclose(loss, ref, rtol=1e-5, atol=1e-5), (loss, ref)

    print("KERNEL_OK")
</pallas_src>

<mosaic_0001>
module attributes {stable_mosaic.version = 11 : i64} {
  func.func @_focal_loss_kernel(%arg0: i32, %arg1: i32, %arg2: memref<8x32xf32, #tpu.memory_space<vmem>>, %arg3: memref<8x1xi32, #tpu.memory_space<vmem>>, %arg4: memref<8x128xf32, #tpu.memory_space<vmem>>, %arg5: memref<1x1xf32, #tpu.memory_space<vmem>>) attributes {dimension_semantics = [#tpu.dimension_semantics<parallel>, #tpu.dimension_semantics<arbitrary>], iteration_bounds = array<i64: 2, 2>, scalar_prefetch = 0 : i64, scratch_operands = 1 : i64, tpu.core_type = #tpu.core_type<tc>, window_params = [{transform_indices = @transform_0, window_bounds = array<i64: 8, 32>}, {transform_indices = @transform_1, window_bounds = array<i64: 8, 1>}, {transform_indices = @transform_2, window_bounds = array<i64: 8, 128>}]} {
    %c0_i32 = arith.constant 0 : i32
    %0 = arith.cmpi eq, %arg1, %c0_i32 : i32
    %1 = arith.extui %0 : i1 to i32
    %c0_i32_0 = arith.constant 0 : i32
    %2 = arith.cmpi ne, %1, %c0_i32_0 : i32
    scf.if %2 {
      %cst_17 = arith.constant 0.000000e+00 : f32
      %51 = vector.broadcast %cst_17 : f32 to vector<1x1xf32>
      %c0_18 = arith.constant 0 : index
      %c0_19 = arith.constant 0 : index
      %52 = vector.load %arg5[%c0_18, %c0_19] : memref<1x1xf32, #tpu.memory_space<vmem>>, vector<1x1xf32>
      tpu.vector_store %arg5[%c0_18, %c0_19], %51 {strides = array<i32>} : memref<1x1xf32, #tpu.memory_space<vmem>>, vector<1x1xf32>,
    } else {
    }
    %c0 = arith.constant 0 : index
    %c0_1 = arith.constant 0 : index
    %3 = vector.load %arg2[%c0, %c0_1] : memref<8x32xf32, #tpu.memory_space<vmem>>, vector<8x32xf32>
    %c0_2 = arith.constant 0 : index
    %c0_3 = arith.constant 0 : index
    %4 = vector.load %arg3[%c0_2, %c0_3] : memref<8x1xi32, #tpu.memory_space<vmem>>, vector<8x1xi32>
    %cst = arith.constant dense<0xFF800000> : vector<8xf32>
    %5 = vector.multi_reduction <maximumf>, %3, %cst [1] : vector<8x32xf32> to vector<8xf32>
    %6 = vector.shape_cast %5 : vector<8xf32> to vector<8x1xf32>
    %7 = vector.broadcast %6 : vector<8x1xf32> to vector<8x32xf32>
    %8 = arith.subf %3, %7 : vector<8x32xf32>
    %9 = math.exp %8 : vector<8x32xf32>
    %cst_4 = arith.constant dense<0.000000e+00> : vector<8xf32>
    %10 = vector.multi_reduction <add>, %9, %cst_4 [1] : vector<8x32xf32> to vector<8xf32>
    %11 = vector.shape_cast %10 : vector<8xf32> to vector<8x1xf32>
    %12 = math.log %11 : vector<8x1xf32>
    %13 = tpu.iota {dimensions = array<i32: 1>} : vector<8x32xi32>
    %14 = vector.broadcast %4 : vector<8x1xi32> to vector<8x32xi32>
    %15 = arith.cmpi eq, %13, %14 : vector<8x32xi32>
    %cst_5 = arith.constant 0.000000e+00 : f32
    %16 = vector.broadcast %cst_5 : f32 to vector<8x32xf32>
    %17 = arith.select %15, %8, %16 : vector<8x32xi1>, vector<8x32xf32>
    %cst_6 = arith.constant dense<0.000000e+00> : vector<8xf32>
    %18 = vector.multi_reduction <add>, %17, %cst_6 [1] : vector<8x32xf32> to vector<8xf32>
    %19 = vector.shape_cast %18 : vector<8xf32> to vector<8x1xf32>
    %20 = arith.subf %12, %19 : vector<8x1xf32>
    %cst_7 = arith.constant 0.000000e+00 : f32
    %21 = vector.broadcast %cst_7 : f32 to vector<8x1xf32>
    %22 = arith.maximumf %20, %21 : vector<8x1xf32>
    %cst_8 = arith.constant 0.000000e+00 : f32
    %23 = vector.broadcast %cst_8 : f32 to vector<8x1xf32>
    %24 = arith.subf %23, %22 : vector<8x1xf32>
    %25 = math.exp %24 : vector<8x1xf32>
    %cst_9 = arith.constant 1.000000e+00 : f32
    %26 = vector.broadcast %cst_9 : f32 to vector<8x1xf32>
    %27 = arith.subf %26, %25 : vector<8x1xf32>
    %28 = arith.mulf %27, %27 : vector<8x1xf32>
    %29 = arith.mulf %28, %22 : vector<8x1xf32>
    %30 = tpu.iota {dimensions = array<i32: 0>} : vector<8x1xi32>
    %c2_i32 = arith.constant 2 : i32
    %31 = arith.muli %arg0, %c2_i32 : i32
    %32 = arith.addi %31, %arg1 : i32
    %c8_i32 = arith.constant 8 : i32
    %33 = arith.muli %32, %c8_i32 : i32
    %34 = vector.broadcast %33 : i32 to vector<8x1xi32>
    %35 = arith.addi %34, %30 : vector<8x1xi32>
    %c24_i32 = arith.constant 24 : i32
    %36 = vector.broadcast %c24_i32 : i32 to vector<8x1xi32>
    %37 = arith.cmpi slt, %35, %36 : vector<8x1xi32>
    %cst_10 = arith.constant 0.000000e+00 : f32
    %38 = vector.broadcast %cst_10 : f32 to vector<8x1xf32>
    %39 = arith.select %37, %29, %38 : vector<8x1xi1>, vector<8x1xf32>
    %c0_11 = arith.constant 0 : index
    %c0_12 = arith.constant 0 : index
    %40 = vector.load %arg5[%c0_11, %c0_12] : memref<1x1xf32, #tpu.memory_space<vmem>>, vector<1x1xf32>
    %41 = vector.shape_cast %39 : vector<8x1xf32> to vector<1x8x1xf32>
    %cst_13 = arith.constant dense<0.000000e+00> : vector<1xf32>
    %42 = vector.multi_reduction <add>, %41, %cst_13 [1, 2] : vector<1x8x1xf32> to vector<1xf32>
    %43 = vector.shape_cast %42 : vector<1xf32> to vector<1x1x1xf32>
    %44 = vector.extract %43[0, 0, 0] : f32 from vector<1x1x1xf32>
    %45 = vector.broadcast %44 : f32 to vector<1x1xf32>
    %46 = arith.addf %40, %45 : vector<1x1xf32>
    %c0_14 = arith.constant 0 : index
    %c0_15 = arith.constant 0 : index
    %47 = vector.load %arg5[%c0_14, %c0_15] : memref<1x1xf32, #tpu.memory_space<vmem>>, vector<1x1xf32>
    tpu.vector_store %arg5[%c0_14, %c0_15], %46 {strides = array<i32>} : memref<1x1xf32, #tpu.memory_space<vmem>>, vector<1x1xf32>,
    %c1_i32 = arith.constant 1 : i32
    %48 = arith.cmpi eq, %arg1, %c1_i32 : i32
    %49 = arith.extui %48 : i1 to i32
    %c0_i32_16 = arith.constant 0 : i32
    %50 = arith.cmpi ne, %49, %c0_i32_16 : i32
    scf.if %50 {
      %c0_17 = arith.constant 0 : index
      %c0_18 = arith.constant 0 : index
      %51 = vector.load %arg5[%c0_17, %c0_18] : memref<1x1xf32, #tpu.memory_space<vmem>>, vector<1x1xf32>
      %cst_19 = arith.constant 0.0416666679 : f32
      %52 = vector.broadcast %cst_19 : f32 to vector<1x1xf32>
      %53 = arith.mulf %51, %52 : vector<1x1xf32>
      %54 = vector.shape_cast %53 : vector<1x1xf32> to vector<1x1xf32>
      %55 = vector.broadcast %54 : vector<1x1xf32> to vector<8x128xf32>
      %c0_20 = arith.constant 0 : index
      %c0_21 = arith.constant 0 : index
      %56 = vector.load %arg4[%c0_20, %c0_21] : memref<8x128xf32, #tpu.memory_space<vmem>>, vector<8x128xf32>
      tpu.vector_store %arg4[%c0_20, %c0_21], %55 {strides = array<i32>} : memref<8x128xf32, #tpu.memory_space<vmem>>, vector<8x128xf32>,
    } else {
    }
    return
  }
  func.func @transform_0(%arg0: i32, %arg1: i32) -> (i32, i32) {
    %c2_i32 = arith.constant 2 : i32
    %0 = arith.muli %arg0, %c2_i32 : i32
    %1 = arith.addi %0, %arg1 : i32
    %c0_i32 = arith.constant 0 : i32
    %c0_i32_0 = arith.constant 0 : i32
    return %1, %c0_i32 : i32, i32
  }
  func.func @transform_1(%arg0: i32, %arg1: i32) -> (i32, i32) {
    %c2_i32 = arith.constant 2 : i32
    %0 = arith.muli %arg0, %c2_i32 : i32
    %1 = arith.addi %0, %arg1 : i32
    %c0_i32 = arith.constant 0 : i32
    %c0_i32_0 = arith.constant 0 : i32
    return %1, %c0_i32 : i32, i32
  }
  func.func @transform_2(%arg0: i32, %arg1: i32) -> (i32, i32) {
    %c0_i32 = arith.constant 0 : i32
    %c0_i32_0 = arith.constant 0 : i32
    return %arg0, %c0_i32 : i32, i32
  }
}

</mosaic_0001>

<bundles_post_ra>
// kernel: tpu_custom_call.1
= control target key start
LH: loop header
LB: loop body
LE: loop exit
PB: predicated region body
PF: predicated region fallthrough
CT: control target
= control target key end

     0   :  { %7 = vsyncpa [#allocation4], 0  ;;  %s742_s0 = inlined_call_operand.vmem [shape: f32[32,32], index: 0, kind: input, shape index: {}]   ;;  %s743_s1 = inlined_call_operand.vmem [shape: s32[32,1], index: 1, kind: input, shape index: {}]   ;;  %s744_s2 = inlined_call_operand.hbm [shape: f32[16,128], index: 2, kind: output, shape index: {}]  }
   0x1   :  { %9 = vsyncpa [#allocation4 + $0x1], 0  ;;  %s592_s9 = smov 0   ;;  %s594_s10 = smov 0  }
   0x2   :  { %s596_s11 = smov 0   ;;  %s598_s12 = smov 0  }
   0x3   :  { %s600_s13 = smov 0   ;;  %s602_s14 = smov 0  }
   0x4   :  { %s604_s15 = smov 0   ;;  %s606_s16 = smov 0  }
   0x5 LB: > { %s371_s17 = sadd.s32 4294967295, %s571_s16   ;;  %s372_s18 = sadd.s32 4294967294, %s571_s16   ;;  %s571_s16 = sphi %s606_s16, %s15_s16   ;;  %s567_s15 = sphi %s604_s15, %s753_s15   ;;  %s563_s14 = sphi %s602_s14, %s752_s14   ;;  %s559_s13 = sphi %s600_s13, %s751_s13   ;;  %s555_s12 = sphi %s598_s12, %s750_s12   ;;  %s551_s11 = sphi %s596_s11, %s749_s11   ;;  %s547_s10 = sphi %s594_s10, %s748_s10   ;;  %s543_s9 = sphi %s592_s9, %s747_s9  }
   0x6   : > { %s24_s19 = sadd.s32 1, %s563_s14  ;;  %s27_s20 = sadd.s32 1, %s567_s15 }
   0x7   : > { %p25_p0 = scmp.ge.s32.totalorder %s24_s19, 2  ;;  %p104_p1 = scmp.ne.s32.totalorder %s551_s11, %s547_s10 }
   0x8   : > { %p105_p2 = scmp.eq.s32.totalorder %s371_s17, 3  ;;  %p110_p4 = scmp.ne.s32.totalorder %s547_s10, %s543_s9 }
   0x9   : > { %s755_s19 = smov (%p25_p0, %s24_s19), 0  ;;  %s757_s20 = smov (!%p25_p0, %s27_s20), %s567_s15 }
   0xa   : > { %p641_p3 = por %p105_p2, %p104_p1  ;;  %p29_p5 = scmp.ge.s32.totalorder %s757_s20, 2 }
   0xb   : > { %p111_p6 = scmp.eq.s32.totalorder %s372_s18, 3  ;;  %p379_p7 = scmp.ge.s32.totalorder %s571_s16, 1 }
   0xc   : > { %p151_p8 = scmp.lt.s32.totalorder %s571_s16, 5  ;;  %s759_s20 = smov (%p29_p5, %s757_s20), 0 }
   0xd   : > { %p651_p9 = por %p111_p6, %p110_p4  ;;  %s91_s23 = ssub.s32 %s567_s15, %s759_s20 }
   0xe   : > { %p152_p10 = pnand %p379_p7, %p151_p8  ;;  %s94_s24 = sadd.s32 1, %s551_s11 }
   0xf   : > { %p92_p11 = scmp.eq.s32.totalorder %s91_s23, 0  ;;  %s177_s26 = sand.u32 (!%p152_p10), 1, %s547_s10  }
  0x10   : > { %155 = sbr.rel (%p152_p10) target bundleno = 745 (0x2e9), region = 28  ;;  %s381_s27 = sshll.u32 (!%p152_p10), %s559_s13, 1 }
  0x11   : > { %s659_s25 = scalar_select %p92_p11, %s551_s11, %s94_s24  }
  0x12   : > { %s665_s28 = sshll.u32 (!%p152_p10), %s177_s26, 3  ;;  %s668_s29 = sadd.s32 (!%p152_p10), %s555_s12, %s381_s27 }
  0x13   : > { %p182_p12 = scmp.lt.s32.totalorder (!%p152_p10), %s668_s29, 3  ;;  %s179_s18 = scalar_lea.vmem (!%p152_p10), [#allocation3], %s665_s28 }
  0x14   : > { %p385_p13 = scmp.ne.s32.totalorder (!%p152_p10), %s555_s12, 0 }
  0x17   : > { %s183_s30 = scalar_select %p182_p12, %s668_s29, 3 }
  0x18   : > { %199 = sbr.rel (%p385_p13) target bundleno = 31 (0x1f), region = 32  ;;  %vm200_vm0 = vcmask (!%p385_p13), 0   ;;  %v573_v0 = vmov (!%p385_p13), 0.0  }
  0x19   : > { %s382_s3 = sshll.u32 %s183_s30, 3  ;;  %201 = vst.msk [vmem:[#allocation2] sm:$0x1] (!%p385_p13), %vm200_vm0, %v573_v0 }
  0x1a   : > { %s185_s6 = scalar_lea.vmem %s742_s0, %s382_s3  ;;  %s193_s17 = scalar_lea.vmem %s743_s1, %s382_s3 }
  0x1f PF: > { %v202_v1 = vld [vmem:[%s185_s6] sm:$0xff]  ;;  %vm204_vm1 = vcmask 261120   ;;  %v574_v3 = vmov 0   ;;  %v216_v8 = vlaneseq  ;;  %s387_s23 = sshll.u32 %s668_s29, 3  ;;  %vm244_vm4 = vcmask 7168   ;;  %p388_p0 = scmp.ne.s32.totalorder %s555_s12, 1 }
  0x20   : > { %v205_v2 = vsel %vm204_vm1, %v202_v1, -inf  ;;  %469 = vset.pattern.permute.xlu0 %v574_v3  ;;  %v203_v4 = vld [vmem:[%s193_s17] sm:$0xff]  ;;  %v239_v24 = vstv %s387_s23  ;;  %vm257_vm5 = vcmask 0   ;;  %v575_v44 = vmov (!%p388_p0), 0  }
  0x21   : > { %206 = vmax.xlane.f32.xlu0 %v205_v2  ;;  %v217_v9 = vand.u32 127, %v216_v8  ;;  %v235_v23 = vshrl.u32 %v216_v8, 7  ;;  %v243_v39 = vld [vmem:[#allocation2] sm:$0x1] }
  0x23   : > { %v240_v26 = vadd.s32 %v239_v24, %v235_v23  ;;  %v268_v43 = vsub.s32 (!%p388_p0), 0, %v235_v23 }
  0x25   : > { %vm241_vm3 = vcmp.lt.s32.totalorder %v240_v26, 24 }
  0x37   : > { %219 = vperm.xlu0 %469, %v203_v4  }
  0x3b   : > { %476 = vset.pattern.permute.xlu0 (!%p388_p0), %v575_v44 }
  0xae   : > { %v207_v5 = vpop.xlane.xlu0 %206 }
  0xaf   : > { %v208_v6 = vsub.f32 %v202_v1, %v207_v5 }
  0xb1   : > { %v209_v7 = vmul.f32 1.442695, %v208_v6 }
  0xb3   : > { %470 = vpow2.f32 %v209_v7 }
  0xb6   : > { %v220_v10 = vpop.permute.xlu0 %219 }
  0xb7   : > { %vm221_vm2 = vcmp.eq.s32.totalorder %v217_v9, %v220_v10 }
  0xb8   : > { %v222_v13 = vsel %vm221_vm2, %v208_v6, 0.0 }
  0xb9   : > { %v223_v14 = vsel %vm204_vm1, %v222_v13, 0.0 }
  0xbd   : > { %v471_v11 = vpop.eup %470 }
  0xbe   : > { %v211_v12 = vsel %vm204_vm1, %v471_v11, 0.0 }
  0xbf   : > { %212 = vadd.xlane.f32.xlu1 %v211_v12 }
  0xc3   : > { %224 = vadd.xlane.f32.xlu1 %v223_v14 }
 0x14c   : > { %v213_v15 = vpop.xlane.xlu1 %212 }
 0x14d   : > { %472 = vlog2.f32 %v213_v15 }
 0x150   : > { %v225_v18 = vpop.xlane.xlu1 %224 }
 0x157   : > { %v473_v16 = vpop.eup %472 }
 0x158   : > { %v215_v17 = vmul.f32 0.6931472, %v473_v16 }
 0x15a   : > { %v226_v19 = vsub.f32 %v215_v17, %v225_v18 }
 0x15c   : > { %v227_v20 = vmax.f32 %v226_v19, 0.0 }
 0x15e   : > { %v228_v21 = vsub.f32 0.0, %v227_v20 }
 0x160   : > { %v229_v22 = vmul.f32 1.442695, %v228_v21 }
 0x162   : > { %474 = vpow2.f32 %v229_v22 }
 0x16c   : > { %v475_v25 = vpop.eup %474 }
 0x16d   : > { %v231_v27 = vsub.f32 1.0, %v475_v25 }
 0x16f   : > { %v232_v28 = vmul.f32 %v231_v27, %v231_v27 }
 0x171   : > { %v233_v29 = vmul.f32 %v232_v28, %v227_v20 }
 0x173   : > { %v242_v30 = vsel %vm241_vm3, %v233_v29, 0.0 }
 0x174   : > { %v245_v31 = vsel %vm244_vm4, %v242_v30, 0.0 }
 0x175   : > { %246 = vadd.xlane.f32.xlu1 %v245_v31 }
 0x202   : > { %v247_v32 = vpop.xlane.xlu1 %246 }
 0x203   : > { %v248_v33 = vrot.slane %v247_v32, 4 }
 0x205   : > { %v249_v34 = vadd.f32 %v248_v33, %v247_v32 }
 0x207   : > { %v250_v35 = vrot.slane %v249_v34, 2 }
 0x209   : > { %v251_v36 = vadd.f32 %v250_v35, %v249_v34 }
 0x20b   : > { %v252_v37 = vrot.slane %v251_v36, 1 }
 0x20d   : > { %v253_v38 = vadd.f32 %v252_v37, %v251_v36 }
 0x20f   : > { %393 = vpush %v253_v38 }
 0x23e   : > { %262 = sbr.rel (%p388_p0) target bundleno = 721 (0x2d1), region = 36 }
 0x240   : > { %s394_s24 = spop %393 }
 0x241   : > { %v255_v40 = vstv %s394_s24 }
 0x242   : > { %v256_v41 = vadd.f32 %v255_v40, %v243_v39 }
 0x244   : > { %258 = vst.msk [vmem:[#allocation2] sm:$0x1] %vm257_vm5, %v256_v41 }
 0x24b   : > { %v263_v42 = vld [vmem:[#allocation2] sm:$0x1] }
 0x24c   : > { %v264_v45 = vmul.f32 0.041666668, %v263_v42 }
 0x24e   : > { %v269_v46 = vrot.slane %v264_v45, %v268_v43 }
 0x250   : > { %271 = vperm.xlu0 %476, %v269_v46  }
 0x2cf   : > { %v272_v47 = vpop.permute.xlu0 %271 }
 0x2d0   : > { %274 = vst [vmem:[%s179_s18] sm:$0xff] %v272_v47 }
 0x2d1 PF: > { %s390_s27 = sshll.u32 %s559_s13, 7  ;;  %s289_s3 = sshll.u32 %s179_s18, 4  ;;  %s290_s3 = int_to_ptr.vmem [resolvable:$true] %s289_s3 }
 0x2d2   : > { %s691_s30 = scalar_lea.hbm %s744_s2, %s390_s27  ;;  %s276_s4 = scalar_lea.sflag [#allocation4], %s177_s26 }
 0x2d3   : > { %s477_s5 = scalar_lea.vmem %s290_s3, 128  ;;  %s576_s6 = smov [#allocation3]  }
 0x2d4   : > { %p478_p1 = scmp.ne.s32.totalorder %s290_s3, %s477_s5  ;;  %s481_s7 = sshll.u32 %s576_s6, 4  ;;  %s482_s7 = int_to_ptr.vmem [resolvable:$false] %s481_s7 }
 0x2d5   : > { %s483_s8 = scalar_lea.vmem %s482_s7, 256  ;;  %p484_p5 = scmp.lt.s32.totalorder %s290_s3, %s482_s7 }
 0x2d6   : > { %p479_p2 = pnand %p478_p1, %p641_p3  ;;  %p485_p6 = scmp.lt.s32.totalorder %s483_s8, %s477_s5 }
 0x2d8   : > { %p480_p4 = pneg %p479_p2  ;;  %p486_p7 = por %p485_p6, %p484_p5 }
 0x2da   : > { %p487_p8 = pnand %p486_p7, %p480_p4 }
 0x2dc   : > { %490 = shalt.err (!%p487_p8)
}
 0x2dd   : > { %s491_s13 = scalar_lea.hbm %s691_s30, 128  ;;  %s495_s17 = scalar_lea.hbm %s744_s2, 256 }
 0x2de   : > { %p492_p10 = scmp.ne.s32.totalorder %s691_s30, %s491_s13  ;;  %p496_p13 = scmp.lt.u32.totalorder %s691_s30, %s744_s2 }
 0x2df   : > { %p497_p0 = scmp.lt.u32.totalorder %s495_s17, %s491_s13  ;;  %p499_p2 = scmp.lt.u32.totalorder %s491_s13, %s691_s30 }
 0x2e0   : > { %p493_p11 = pnand %p492_p10, %p641_p3 }
 0x2e1   : > { %p498_p1 = por %p497_p0, %p496_p13 }
 0x2e2   : > { %p494_p12 = pneg %p493_p11 }
 0x2e3   : > { %p500_p4 = por %p499_p2, %p498_p1 }
 0x2e5   : > { %p501_p5 = pnand %p500_p4, %p494_p12 }
 0x2e7   : > { %504 = shalt.err (!%p501_p5)
}
 0x2e8   : > { %395 = dma.vmem_to_hbm [thread:$0]  (%p641_p3), %s290_s3, 128, %s691_s30, %s276_s4  }
 0x2e9 PF: > { %p401_p6 = scmp.ge.s32.totalorder %s571_s16, 2  ;;  %s301_s24 = sand.u32 1, %s543_s9  }
 0x2ea   : > { %s302_s27 = scalar_lea.sflag [#allocation4], %s301_s24 }
 0x2eb   : > { %p398_p7 = pnand %p401_p6, %p651_p9 }
 0x2ed   : > { %538 = dma.done.wait (!%p398_p7), %s302_s27, 128  }
 0x2ee   : > { %540 = vsyncadd (!%p398_p7), %s302_s27, 4294967168  ;;  %s15_s16 = sadd.s32 1, %s571_s16   ;;  %s747_s9 = smov %s547_s10 }
 0x2ef   : > { %p12_p8 = scmp.ge.s32.totalorder %s15_s16, 6   ;;  %s748_s10 = smov %s551_s11 }
 0x2f0   : > { %s749_s11 = smov %s659_s25  ;;  %s750_s12 = smov %s563_s14 }
 0x2f1   : > { %s751_s13 = smov %s567_s15  ;;  %s752_s14 = smov %s755_s19 }
 0x2f2   : > { %s753_s15 = smov %s759_s20  ;;  %14 = sbr.rel (!%p12_p8) target bundleno = 5 (0x5), region = 74 }
 0x2f9   :  { %307 = vsyncpa [#allocation4], 1 }
 0x2fa   :  { %309 = vsyncpa [#allocation4 + $0x1], 1 }

</bundles_post_ra>
